<compile_context>
chip_gen: v5e
topology: v5e:2x2
jax: 0.10.0
libtpu: 0.0.40
codegen_flags: <defaults>
</compile_context>

<pallas_src>
import functools

import jax
import jax.numpy as jnp
from jax.experimental import pallas as pl
from jax.experimental.pallas import tpu as pltpu


def _mlp_kernel(z_ref, w1_ref, b1_ref, w2_ref, b2_ref, w3_ref, b3_ref, o_ref):
    # Layer 1: (n+1, n) @ (n, TM) + b1_eff -> ReLU   (t already folded into b1)
    h1 = jnp.dot(w1_ref[...], z_ref[...], preferred_element_type=jnp.float32)
    h1 = jnp.maximum(h1 + b1_ref[...], 0.0)
    # Layer 2: (n, n+1) @ (n+1, TM) + b2 -> ReLU
    h2 = jnp.dot(w2_ref[...], h1.astype(w2_ref.dtype),
                 preferred_element_type=jnp.float32)
    h2 = jnp.maximum(h2 + b2_ref[...], 0.0)
    # Layer 3: (n, n) @ (n, TM) + b3 -> ReLU
    h3 = jnp.dot(w3_ref[...], h2.astype(w3_ref.dtype),
                 preferred_element_type=jnp.float32)
    o_ref[...] = jnp.maximum(h3 + b3_ref[...], 0.0).astype(o_ref.dtype)


def neural_spring_forward(t, z, params, *, compute_dtype=jnp.float32, tm=None):
    """t: scalar, z: (n, m) float32. Returns f: (n, m) float32.

    compute_dtype: dtype of the matmul stream (jnp.bfloat16 halves HBM/VMEM
    traffic on v6e/v7x; accumulation stays fp32 either way).
    tm: batch tile on the lane axis (must be a multiple of 128). Weights stay
    resident; the z / output tiles are double-buffered across grid steps.
    """
    (w1, b1), (w2, b2), (w3, b3) = params
    n, m = z.shape
    f32 = jnp.float32

    # Fold t into layer-1 bias and drop the t column of W1 -> no concat, no
    # (n+1, m) HBM copy, no odd 9-wide activation input.
    b1_eff = (b1 + t * w1[:, 0]).astype(f32).reshape(n + 1, 1)
    w1z = w1[:, 1:]                                  # (n+1, n), (out, in)
    b2c = b2.astype(f32).reshape(n, 1)
    b3c = b3.astype(f32).reshape(n, 1)

    # MXU / DMA stream dtype.
    zc = z.astype(compute_dtype)
    w1c = w1z.astype(compute_dtype)
    w2c = w2.astype(compute_dtype)
    w3c = w3.astype(compute_dtype)

    # Always pad the batch (lane) axis to a multiple of 128 -> unmasked stores.
    m128 = pl.cdiv(m, 128) * 128
    if tm is None:
        # Large tiles: compute per step is tiny, so amortize the ~0.35 us
        # per-step overhead.  Even tm=4096 keeps each buffered activation tile
        # at n*4096*4 B ~= a few hundred KiB, trivial against 64 MiB VMEM (v7x).
        tm = m128 if m128 <= 4096 else 2048
    if tm % 128 != 0:
        raise ValueError(f"tm={tm} must be a multiple of 128")
    m_pad = pl.cdiv(m128, tm) * tm
    if m_pad != m:
        zc = jnp.pad(zc, ((0, 0), (0, m_pad - m)))
    grid = (m_pad // tm,)

    # Advisory cost estimate so XLA schedules the custom call sensibly.
    flops = 4 * m * n * (n + 1) + 2 * m * n * n
    bytes_accessed = int(
        zc.size * zc.dtype.itemsize                      # activations in
        + n * m_pad * 4                                  # output (f32)
        + (w1c.size + w2c.size + w3c.size) * w1c.dtype.itemsize
        + (n + 1 + 2 * n) * 4)                           # biases

    def full(shape):
        return pl.BlockSpec(shape, lambda i: (0, 0))

    out = pl.pallas_call(
        _mlp_kernel,
        out_shape=jax.ShapeDtypeStruct((n, m_pad), f32),
        grid=grid,
        in_specs=[
            pl.BlockSpec((n, tm), lambda i: (0, i)),     # z tile over m
            full((n + 1, n)), full((n + 1, 1)),          # W1 (t col dropped), b1_eff
            full((n, n + 1)), full((n, 1)),              # W2, b2
            full((n, n)),     full((n, 1)),              # W3, b3
        ],
        out_specs=pl.BlockSpec((n, tm), lambda i: (0, i)),
        compiler_params=pltpu.CompilerParams(
            dimension_semantics=("parallel",)),
        cost_estimate=pl.CostEstimate(
            flops=flops, transcendentals=0, bytes_accessed=bytes_accessed),
    )(zc, w1c, b1_eff, w2c, b2c, w3c, b3c)

    return out[:, :m] if m_pad != m else out


def init_params(key, n):
    """Deterministic init mimicking nn.Linear default (uniform +-1/sqrt(fan_in))."""
    def linear(k, fan_in, fan_out):
        k_w, k_b = jax.random.split(k)
        bound = 1.0 / jnp.sqrt(fan_in)
        w = jax.random.uniform(k_w, (fan_out, fan_in), jnp.float32, -bound, bound)
        b = jax.random.uniform(k_b, (fan_out,), jnp.float32, -bound, bound)
        return w, b

    k1, k2, k3 = jax.random.split(key, 3)
    return (linear(k1, n + 1, n + 1),
            linear(k2, n + 1, n),
            linear(k3, n, n))


def _reference(t, z, params):
    (w1, b1), (w2, b2), (w3, b3) = params
    n, m = z.shape
    T = t * jnp.ones((1, m), dtype=z.dtype)
    x = jnp.concatenate((T, z), axis=0).T
    h = jnp.maximum(x @ w1.T + b1, 0.0)
    h = jnp.maximum(h @ w2.T + b2, 0.0)
    h = jnp.maximum(h @ w3.T + b3, 0.0)
    return h.T


if __name__ == "__main__":
    n, m = 8, 256
    key = jax.random.PRNGKey(0)
    k_params, k_z = jax.random.split(key)

    params = init_params(k_params, n)
    z = jax.random.normal(k_z, (n, m), dtype=jnp.float32)
    t = jnp.float32(0.5)

    f_ref = _reference(t, z, params)

    # fp32 path, tiled over m (tm=128 -> grid=(2,)) to exercise the grid.
    fwd_f32 = jax.jit(functools.partial(
        neural_spring_forward, params=params,
        compute_dtype=jnp.float32, tm=128))
    f = jax.block_until_ready(fwd_f32(t, z))
    assert f.shape == (n, m)
    assert jnp.allclose(f, f_ref, atol=1e-5, rtol=1e-5)

    # Default tile selection (single full-m block, grid=(1,)).
    f_full = jax.block_until_ready(
        neural_spring_forward(t, z, params, compute_dtype=jnp.float32))
    assert jnp.allclose(f_full, f_ref, atol=1e-5, rtol=1e-5)

    # Non-multiple-of-128 batch -> exercises lane padding + crop.
    m2 = 200
    z2 = jax.random.normal(jax.random.PRNGKey(3), (n, m2), dtype=jnp.float32)
    f2 = jax.block_until_ready(
        neural_spring_forward(t, z2, params, compute_dtype=jnp.float32))
    assert f2.shape == (n, m2)
    assert jnp.allclose(f2, _reference(t, z2, params), atol=1e-5, rtol=1e-5)

    # bf16 matmul stream (fp32 accumulation) -- the v6e/v7x DMA-halving config.
    f_bf16 = jax.block_until_ready(
        neural_spring_forward(t, z, params, compute_dtype=jnp.bfloat16, tm=128))
    assert f_bf16.shape == (n, m)
    assert jnp.allclose(f_bf16, f_ref, atol=1e-1, rtol=1e-1)

    print("KERNEL_OK")
</pallas_src>

<mosaic_0001>
module attributes {stable_mosaic.version = 11 : i64} {
  func.func @_mlp_kernel(%arg0: i32, %arg1: memref<8x128xf32, #tpu.memory_space<vmem>>, %arg2: memref<9x8xf32, #tpu.memory_space<vmem>>, %arg3: memref<9x1xf32, #tpu.memory_space<vmem>>, %arg4: memref<8x9xf32, #tpu.memory_space<vmem>>, %arg5: memref<8x1xf32, #tpu.memory_space<vmem>>, %arg6: memref<8x8xf32, #tpu.memory_space<vmem>>, %arg7: memref<8x1xf32, #tpu.memory_space<vmem>>, %arg8: memref<8x128xf32, #tpu.memory_space<vmem>>) attributes {dimension_semantics = [#tpu.dimension_semantics<parallel>], iteration_bounds = array<i64: 2>, scalar_prefetch = 0 : i64, scratch_operands = 0 : i64, tpu.core_type = #tpu.core_type<tc>, window_params = [{transform_indices = @transform_0, window_bounds = array<i64: 8, 128>}, {pipeline_mode = #tpu.pipeline_mode<synchronous>, transform_indices = @transform_1, window_bounds = array<i64: 9, 8>}, {pipeline_mode = #tpu.pipeline_mode<synchronous>, transform_indices = @transform_2, window_bounds = array<i64: 9, 1>}, {pipeline_mode = #tpu.pipeline_mode<synchronous>, transform_indices = @transform_3, window_bounds = array<i64: 8, 9>}, {pipeline_mode = #tpu.pipeline_mode<synchronous>, transform_indices = @transform_4, window_bounds = array<i64: 8, 1>}, {pipeline_mode = #tpu.pipeline_mode<synchronous>, transform_indices = @transform_5, window_bounds = array<i64: 8, 8>}, {pipeline_mode = #tpu.pipeline_mode<synchronous>, transform_indices = @transform_6, window_bounds = array<i64: 8, 1>}, {transform_indices = @transform_7, window_bounds = array<i64: 8, 128>}]} {
    %c0 = arith.constant 0 : index
    %c0_0 = arith.constant 0 : index
    %0 = vector.load %arg2[%c0, %c0_0] : memref<9x8xf32, #tpu.memory_space<vmem>>, vector<9x8xf32>
    %c0_1 = arith.constant 0 : index
    %c0_2 = arith.constant 0 : index
    %1 = vector.load %arg1[%c0_1, %c0_2] : memref<8x128xf32, #tpu.memory_space<vmem>>, vector<8x128xf32>
    %cst = arith.constant dense<0.000000e+00> : vector<9x128xf32>
    %2 = tpu.matmul %0, %1, %cst {dimension_numbers = #tpu.dot_dimension_numbers<[1], [0], [0], [1], [0, 0, 1, 1], [], []>} : vector<9x8xf32>, vector<8x128xf32>, vector<9x128xf32> -> vector<9x128xf32>
    %c0_3 = arith.constant 0 : index
    %c0_4 = arith.constant 0 : index
    %3 = vector.load %arg3[%c0_3, %c0_4] : memref<9x1xf32, #tpu.memory_space<vmem>>, vector<9x1xf32>
    %4 = vector.broadcast %3 : vector<9x1xf32> to vector<9x128xf32>
    %5 = arith.addf %2, %4 : vector<9x128xf32>
    %cst_5 = arith.constant 0.000000e+00 : f32
    %6 = vector.broadcast %cst_5 : f32 to vector<9x128xf32>
    %7 = arith.maximumf %5, %6 : vector<9x128xf32>
    %c0_6 = arith.constant 0 : index
    %c0_7 = arith.constant 0 : index
    %8 = vector.load %arg4[%c0_6, %c0_7] : memref<8x9xf32, #tpu.memory_space<vmem>>, vector<8x9xf32>
    %cst_8 = arith.constant dense<0.000000e+00> : vector<8x128xf32>
    %9 = tpu.matmul %8, %7, %cst_8 {dimension_numbers = #tpu.dot_dimension_numbers<[1], [0], [0], [1], [0, 0, 1, 1], [], []>} : vector<8x9xf32>, vector<9x128xf32>, vector<8x128xf32> -> vector<8x128xf32>
    %c0_9 = arith.constant 0 : index
    %c0_10 = arith.constant 0 : index
    %10 = vector.load %arg5[%c0_9, %c0_10] : memref<8x1xf32, #tpu.memory_space<vmem>>, vector<8x1xf32>
    %11 = vector.broadcast %10 : vector<8x1xf32> to vector<8x128xf32>
    %12 = arith.addf %9, %11 : vector<8x128xf32>
    %cst_11 = arith.constant 0.000000e+00 : f32
    %13 = vector.broadcast %cst_11 : f32 to vector<8x128xf32>
    %14 = arith.maximumf %12, %13 : vector<8x128xf32>
    %c0_12 = arith.constant 0 : index
    %c0_13 = arith.constant 0 : index
    %15 = vector.load %arg6[%c0_12, %c0_13] : memref<8x8xf32, #tpu.memory_space<vmem>>, vector<8x8xf32>
    %cst_14 = arith.constant dense<0.000000e+00> : vector<8x128xf32>
    %16 = tpu.matmul %15, %14, %cst_14 {dimension_numbers = #tpu.dot_dimension_numbers<[1], [0], [0], [1], [0, 0, 1, 1], [], []>} : vector<8x8xf32>, vector<8x128xf32>, vector<8x128xf32> -> vector<8x128xf32>
    %c0_15 = arith.constant 0 : index
    %c0_16 = arith.constant 0 : index
    %17 = vector.load %arg7[%c0_15, %c0_16] : memref<8x1xf32, #tpu.memory_space<vmem>>, vector<8x1xf32>
    %18 = vector.broadcast %17 : vector<8x1xf32> to vector<8x128xf32>
    %19 = arith.addf %16, %18 : vector<8x128xf32>
    %cst_17 = arith.constant 0.000000e+00 : f32
    %20 = vector.broadcast %cst_17 : f32 to vector<8x128xf32>
    %21 = arith.maximumf %19, %20 : vector<8x128xf32>
    %c0_18 = arith.constant 0 : index
    %c0_19 = arith.constant 0 : index
    %22 = vector.load %arg8[%c0_18, %c0_19] : memref<8x128xf32, #tpu.memory_space<vmem>>, vector<8x128xf32>
    tpu.vector_store %arg8[%c0_18, %c0_19], %21 {strides = array<i32>} : memref<8x128xf32, #tpu.memory_space<vmem>>, vector<8x128xf32>,
    return
  }
  func.func @transform_0(%arg0: i32) -> (i32, i32) {
    %c0_i32 = arith.constant 0 : i32
    %c0_i32_0 = arith.constant 0 : i32
    return %c0_i32, %arg0 : i32, i32
  }
  func.func @transform_1(%arg0: i32) -> (i32, i32) {
    %c0_i32 = arith.constant 0 : i32
    %c0_i32_0 = arith.constant 0 : i32
    %c0_i32_1 = arith.constant 0 : i32
    return %c0_i32, %c0_i32_0 : i32, i32
  }
  func.func @transform_2(%arg0: i32) -> (i32, i32) {
    %c0_i32 = arith.constant 0 : i32
    %c0_i32_0 = arith.constant 0 : i32
    %c0_i32_1 = arith.constant 0 : i32
    return %c0_i32, %c0_i32_0 : i32, i32
  }
  func.func @transform_3(%arg0: i32) -> (i32, i32) {
    %c0_i32 = arith.constant 0 : i32
    %c0_i32_0 = arith.constant 0 : i32
    %c0_i32_1 = arith.constant 0 : i32
    return %c0_i32, %c0_i32_0 : i32, i32
  }
  func.func @transform_4(%arg0: i32) -> (i32, i32) {
    %c0_i32 = arith.constant 0 : i32
    %c0_i32_0 = arith.constant 0 : i32
    %c0_i32_1 = arith.constant 0 : i32
    return %c0_i32, %c0_i32_0 : i32, i32
  }
  func.func @transform_5(%arg0: i32) -> (i32, i32) {
    %c0_i32 = arith.constant 0 : i32
    %c0_i32_0 = arith.constant 0 : i32
    %c0_i32_1 = arith.constant 0 : i32
    return %c0_i32, %c0_i32_0 : i32, i32
  }
  func.func @transform_6(%arg0: i32) -> (i32, i32) {
    %c0_i32 = arith.constant 0 : i32
    %c0_i32_0 = arith.constant 0 : i32
    %c0_i32_1 = arith.constant 0 : i32
    return %c0_i32, %c0_i32_0 : i32, i32
  }
  func.func @transform_7(%arg0: i32) -> (i32, i32) {
    %c0_i32 = arith.constant 0 : i32
    %c0_i32_0 = arith.constant 0 : i32
    return %c0_i32, %arg0 : i32, i32
  }
}

</mosaic_0001>

<bundles_post_ra>
// kernel: neural_spring_forward.1
= control target key start
LH: loop header
LB: loop body
LE: loop exit
PB: predicated region body
PF: predicated region fallthrough
CT: control target
= control target key end

     0   :  { %12 = vsyncpa [#allocation3], 0  ;;  %s905_s0 = inlined_call_operand.vmem [shape: f32[8,256], index: 0, kind: input, shape index: {}]   ;;  %s906_s1 = inlined_call_operand.vmem [shape: f32[9,8], index: 1, kind: input, shape index: {}]   ;;  %s907_s2 = inlined_call_operand.vmem [shape: f32[9,1], index: 2, kind: input, shape index: {}]   ;;  %s908_s3 = inlined_call_operand.vmem [shape: f32[8,9], index: 3, kind: input, shape index: {}]   ;;  %s909_s4 = inlined_call_operand.hbm [shape: f32[8,1], index: 4, kind: input, shape index: {}]   ;;  %s910_s5 = inlined_call_operand.vmem [shape: f32[8,8], index: 5, kind: input, shape index: {}]   ;;  %s911_s6 = inlined_call_operand.hbm [shape: f32[8,1], index: 6, kind: input, shape index: {}]   ;;  %s912_s7 = inlined_call_operand.hbm [shape: f32[8,256], index: 7, kind: output, shape index: {}]  }
   0x1   :  { %13 = vsyncpa [#allocation6], 0 }
   0x2   :  { %14 = vsyncpa [#allocation4], 0 }
   0x3   :  { %16 = vsyncpa [#allocation4 + $0x1], 0  ;;  %s774_s24 = smov 0   ;;  %s776_s25 = smov 0  }
   0x4   :  { %s778_s26 = smov 0   ;;  %s780_s27 = smov 0  }
   0x5 LB: > { %s795_s28 = sadd.s32 4294967295, %s729_s27   ;;  %s516_s29 = sadd.s32 4294967294, %s729_s27   ;;  %s729_s27 = sphi %s780_s27, %s919_s27   ;;  %s725_s26 = sphi %s778_s26, %s918_s26   ;;  %s721_s25 = sphi %s776_s25, %s917_s25   ;;  %s717_s24 = sphi %s774_s24, %s916_s24  }
   0x6   : > { %s799_s30 = sadd.s32 1, %s729_s27   ;;  %s181_s8 = sadd.s32 1, %s725_s26 }
   0x7   : > { %s178_s9 = ssub.s32 %s729_s27, %s799_s30  ;;  %p191_p0 = scmp.ne.s32.totalorder %s725_s26, %s721_s25 }
   0x8   : > { %p179_p1 = scmp.eq.s32.totalorder %s178_s9, 0  ;;  %p192_p2 = scmp.eq.s32.totalorder %s795_s28, 1 }
   0x9   : > { %p197_p3 = scmp.ne.s32.totalorder %s721_s25, %s717_s24  ;;  %p198_p4 = scmp.eq.s32.totalorder %s516_s29, 1 }
   0xa   : > { %s810_s10 = scalar_select %p179_p1, %s725_s26, %s181_s8  }
   0xb   : > { %p812_p5 = por %p192_p2, %p191_p0  ;;  %p816_p6 = por %p198_p4, %p197_p3 }
   0xc   : > { %p517_p7 = scmp.ge.s32.totalorder %s729_s27, 1  ;;  %p205_p8 = scmp.lt.s32.totalorder %s729_s27, 3 }
   0xd   : > { %p557_p9 = scmp.eq.s32.totalorder %s795_s28, 0  ;;  %s226_s16 = sshll.u32 %s909_s4, 4  ;;  %s227_s16 = int_to_ptr.hbm [resolvable:$true] %s226_s16 }
   0xe   : > { %p823_p10 = pnand %p517_p7, %p205_p8  ;;  %s731_s17 = smov [#allocation2]  }
   0xf   : > { %s228_s18 = sshll.u32 %s731_s17, 4  ;;  %s241_s21 = sshll.u32 %s911_s6, 4  ;;  %s229_s18 = int_to_ptr.vmem [resolvable:$true] %s228_s18  ;;  %s242_s21 = int_to_ptr.hbm [resolvable:$true] %s241_s21 }
  0x10   : > { %p546_p11 = pneg %p823_p10  ;;  %s732_s22 = smov [#allocation5]  }
  0x11   : > { %s243_s23 = sshll.u32 %s732_s22, 4  ;;  %263 = sbr.rel (%p823_p10) target bundleno = 442 (0x1ba), region = 48  ;;  %s244_s23 = int_to_ptr.vmem [resolvable:$true] %s243_s23 }
  0x12   : > { %p547_p12 = pnand %p557_p9, %p546_p11 }
  0x14   : > { %549 = dma.hbm_to_vmem [thread:$0]  (!%p547_p12), %s227_s16, 128, %s229_s18, [#allocation3]  }
  0x15   : > { %552 = dma.hbm_to_vmem [thread:$0]  (!%p547_p12), %s242_s21, 128, %s244_s23, [#allocation6]  }
  0x16   : > { %704 = dma.done.wait (%p557_p9), [#allocation3], 128  }
  0x17   : > { %706 = vsyncadd (%p557_p9), [#allocation3], 4294967168 }
  0x18   : > { %708 = dma.done.wait (%p557_p9), [#allocation6], 128  }
  0x19   : > { %710 = vsyncadd (%p557_p9), [#allocation6], 4294967168  ;;  %p300_p13 = scmp.lt.s32.totalorder %s795_s28, 1  ;;  %v733_v0 = vmov 0   ;;  %vm319_vm0 = vcmask 64512   ;;  %v304_v2 = vld [vmem:[%s906_s1] sm:$0xff] }
  0x1a   : > { %597 = vset.pattern.permute.xlu0 %v733_v0  ;;  %598 = vset.pattern.permute.xlu1 %v733_v0  ;;  %v305_v3 = vld [vmem:[%s906_s1 + $0x8] sm:$0x1]  ;;  %v307_v5 = vld [vmem:[%s907_s2] sm:$0xff]  ;;  %vm362_vm1 = vcmask 1040384   ;;  %vm358_vm2 = vcmask 72704   ;;  %s297_s13 = sand.u32 1, %s721_s25  }
  0x1b   : > { %s301_s29 = scalar_select %p300_p13, %s795_s28, 1  ;;  %v308_v4 = vld [vmem:[%s907_s2 + $0x8] sm:$0x1]  ;;  %v352_v6 = vld [vmem:[#allocation2] sm:$0xff] }
  0x1c   : > { %316 = vperm.xlu0 %597, %v308_v4   ;;  %355 = vperm.xlu1 %598, %v352_v6   ;;  %v388_v7 = vld [vmem:[#allocation5] sm:$0xff]  ;;  %v351_v16 = vld [vmem:[%s908_s3] sm:$0xff]  ;;  %s532_s15 = sshll.u32 %s795_s28, 3  ;;  %s420_s22 = scalar_lea.sflag [#allocation4], %s297_s13 }
  0x1d   : > { %s525_s8 = sshll.u32 %s301_s29, 3  ;;  %v387_v21 = vld [vmem:[%s910_s5] sm:$0xff]  ;;  %s430_s18 = scalar_lea.hbm %s912_s7, %s532_s15 }
  0x1e   : > { %s303_s14 = scalar_lea.vmem %s905_s0, %s525_s8  ;;  %s434_s21 = sshll.u32 %s430_s18, 4  ;;  %s435_s21 = int_to_ptr.hbm [resolvable:$true] %s434_s21 }
  0x1f   : > { %v306_v1 = vld [vmem:[%s303_s14] sm:$0xff]  ;;  %s524_s14 = sshll.u32 %s297_s13, 3  ;;  %s673_s23 = sshra.s32 %s435_s21, 4  ;;  %s674_s23 = int_to_ptr.hbm [resolvable:$true] %s673_s23 }
  0x20   : > { %341 = vmatpush.msra.mxu0 %v306_v1  ;;  %535 = vmatpush.msra.mxu3 %v306_v1  ;;  %s299_s19 = scalar_lea.vmem [#allocation7], %s524_s14  ;;  %s675_s29 = scalar_lea.hbm %s674_s23, 8 }
  0x21   : > { %526 = vmatmul.msk.f32.vlgmr.msra.gmra.mxu0 %vm319_vm0, %v304_v2  ;;  %527 = vmatmul.msk.f32.vlgmr.msra.gmra.mxu3 %vm319_vm0, %v305_v3  ;;  %s432_s20 = sshll.u32 %s299_s19, 4  ;;  %p676_p0 = scmp.ne.s32.totalorder %s674_s23, %s675_s29  ;;  %s433_s20 = int_to_ptr.vmem [resolvable:$true] %s432_s20 }
  0x22   : > { %s679_s9 = scalar_lea.hbm %s912_s7, 16  ;;  %p680_p3 = scmp.lt.s32.totalorder %s674_s23, %s912_s7 }
  0x23   : > { %p677_p1 = pnand %p676_p0, %p812_p5  ;;  %p681_p4 = scmp.lt.s32.totalorder %s679_s9, %s675_s29 }
  0x24   : > { %311 = vperm.xlu0 %597, %v307_v5   ;;  %391 = vperm.xlu1 %598, %v388_v7  }
  0x25   : > { %p678_p2 = pneg %p677_p1  ;;  %p682_p7 = por %p681_p4, %p680_p3 }
  0x27   : > { %p683_p8 = pnand %p682_p7, %p678_p2 }
  0x8e   : > { %v317_v8 = vpop.permute.xlu0 %316  ;;  %v356_v17 = vpop.permute.xlu1 %355 }
  0x96   : > { %v312_v9 = vpop.permute.xlu0 %311  ;;  %v392_v22 = vpop.permute.xlu1 %391 }
  0x9e   : > { %v343_v10 = vpop.f32.mrf.mxu0 }
  0x9f   : > { %v344_v12 = vadd.f32 %v343_v10, %v312_v9 }
  0xa1   : > { %v349_v15 = vmax.f32 %v344_v12, 0.0 }
  0xa4   : > { %v346_v11 = vpop.f32.mrf.mxu3 }
  0xa5   : > { %v347_v13 = vadd.f32 %v346_v11, %v317_v8 }
  0xa7   : > { %v350_v14 = vmax.f32 %v347_v13, 0.0 }
  0xa9   : > { %528 = vmatpush.msk.msra.mxu1 %vm362_vm1, %v350_v14 }
  0xab   : > { %381 = vmatpush.msra.mxu1 %v349_v15 }
  0xac   : > { %529 = vmatmul.msk.f32.vlgmr.msra.gmra.mxu1 %vm358_vm2, %v351_v16 }
 0x129   : > { %v383_v18 = vpop.f32.mrf.mxu1 }
 0x12a   : > { %v384_v19 = vadd.f32 %v383_v18, %v356_v17 }
 0x12c   : > { %v386_v20 = vmax.f32 %v384_v19, 0.0 }
 0x12e   : > { %412 = vmatpush.msra.mxu2 %v386_v20 }
 0x12f   : > { %530 = vmatmul.msk.f32.vlgmr.msra.gmra.mxu2 %vm319_vm0, %v387_v21 }
 0x1b2   : > { %v414_v23 = vpop.f32.mrf.mxu2 }
 0x1b3   : > { %v415_v24 = vadd.f32 %v414_v23, %v392_v22 }
 0x1b5   : > { %v417_v25 = vmax.f32 %v415_v24, 0.0 }
 0x1b7   : > { %418 = vst [vmem:[%s299_s19] sm:$0xff] %v417_v25 }
 0x1b8   : > { %686 = shalt.err (!%p683_p8)
}
 0x1b9   : > { %544 = dma.vmem_to_hbm [thread:$0]  (%p812_p5), %s433_s20, 128, %s435_s21, %s420_s22  }
 0x1ba PF: > { %p561_p9 = scmp.ge.s32.totalorder %s729_s27, 2  ;;  %s446_s13 = sand.u32 1, %s717_s24  }
 0x1bb   : > { %s447_s16 = scalar_lea.sflag [#allocation4], %s446_s13 }
 0x1bc   : > { %p554_p10 = pnand %p561_p9, %p816_p6 }
 0x1be   : > { %p555_p11 = pneg %p554_p10 }
 0x1c0   : > { %712 = dma.done.wait (%p555_p11), %s447_s16, 128  }
 0x1c1   : > { %714 = vsyncadd (%p555_p11), %s447_s16, 4294967168  ;;  %p19_p12 = scmp.ge.s32.totalorder %s799_s30, 4   ;;  %s916_s24 = smov %s721_s25 }
 0x1c2   : > { %s917_s25 = smov %s725_s26  ;;  %s918_s26 = smov %s810_s10 }
 0x1c3   : > { %s919_s27 = smov %s799_s30  ;;  %21 = sbr.rel (!%p19_p12) target bundleno = 5 (0x5), region = 92 }
 0x1c8   :  { %453 = vsyncpa [#allocation3], 1 }
 0x1c9   :  { %455 = vsyncpa [#allocation3 + $0x1], 1 }
 0x1ca   :  { %456 = vsyncpa [#allocation6], 1 }
 0x1cb   :  { %457 = vsyncpa [#allocation4], 1 }
 0x1cc   :  { %459 = vsyncpa [#allocation4 + $0x1], 1 }

</bundles_post_ra>
